<compile_context>
chip_gen: v7x
topology: tpu7x:2x2x1
jax: 0.10.0
libtpu: 0.0.40
codegen_flags: <defaults>
</compile_context>

<pallas_src>
import functools

import jax
import jax.numpy as jnp
from jax.experimental import pallas as pl
from jax.experimental.pallas import tpu as pltpu

HIDDEN = 768
HEAD_SIZES = (3, 3, 3, 3, 3, 2, 3)          # C, I, A, AV, AC, AU, severity
HEAD_NAMES = ("C", "I", "A", "AV", "AC", "AU", "severity")
HEAD_OFFSETS = tuple(int(sum(HEAD_SIZES[:i])) for i in range(len(HEAD_SIZES)))
TOTAL_CLASSES = int(sum(HEAD_SIZES))        # 20
NPAD = 128                                  # class axis padded to one lane tile
NUM_HEADS = len(HEAD_SIZES)                 # 7
NUM_HEADS_PAD = 8                           # head axis padded to 8


def _round_up(x, m):
    return (x + m - 1) // m * m


def _cls_kernel(x_ref, w_ref, b_ref, gcol_ref, logits_ref, loss_ref):
    """Fused 7-head classifier + single-pass cross-entropy.

    x_ref:      [TB, H]       bf16/f32   first_hidden tile
    w_ref:      [H, NPAD]     bf16/f32   fused head weights (zero padded), resident
    b_ref:      [1, NPAD]     f32        fused head biases (zero padded), resident
    gcol_ref:   [TB, 8]       int32      global fused column of the true class per head
    logits_ref: [TB, NPAD]    f32        out: fused logits (padded cols are zero)
    loss_ref:   [TB, 8]       f32        out: per-example per-head CE (col 7 = junk)
    """
    tb = x_ref.shape[0]

    # Fused classifier matmul (MXU), f32 accumulation.
    logits = jnp.dot(x_ref[...], w_ref[...],
                     preferred_element_type=jnp.float32) + b_ref[...]
    logits_ref[...] = logits

    cols = jax.lax.broadcasted_iota(jnp.int32, (tb, NPAD), 1)

    # One-hot of every head's true class at its global fused column.  Head
    # column ranges are disjoint, so a plain sum of 7 compares is exact.
    gcol = gcol_ref[...]                                    # [TB, 8] int32
    onehot = jnp.zeros((tb, NPAD), jnp.float32)
    for h in range(NUM_HEADS):                              # static, VPU-only
        onehot = onehot + (cols == gcol[:, h:h + 1]).astype(jnp.float32)

    # Single-pass softmax pieces.  One global max over the 20 valid columns is
    # a valid stabilizer for every head (it upper-bounds each head's max).
    valid = cols < TOTAL_CLASSES
    masked = jnp.where(valid, logits, jnp.float32(-1e30))   # mask BEFORE exp
    m = jnp.max(masked, axis=-1, keepdims=True)             # [TB, 1], one XLU reduce
    e = jnp.exp(masked - m)                                 # invalid cols -> exactly 0

    # Compile-time head-membership matrix maskT[c, h] = 1 iff column c belongs
    # to head h (built from iota compares; no DMA input needed).
    c2 = jax.lax.broadcasted_iota(jnp.int32, (NPAD, NUM_HEADS_PAD), 0)
    h2 = jax.lax.broadcasted_iota(jnp.int32, (NPAD, NUM_HEADS_PAD), 1)
    lo = jnp.zeros((NPAD, NUM_HEADS_PAD), jnp.int32)
    hi = jnp.zeros((NPAD, NUM_HEADS_PAD), jnp.int32)
    for h, (off, sz) in enumerate(zip(HEAD_OFFSETS, HEAD_SIZES)):
        lo = jnp.where(h2 == h, off, lo)
        hi = jnp.where(h2 == h, off + sz, hi)
    maskT = ((c2 >= lo) & (c2 < hi)).astype(jnp.float32)    # [NPAD, 8]

    # Per-head reductions on the (otherwise idle) MXU.
    sum_e = jnp.dot(e, maskT, preferred_element_type=jnp.float32)        # [TB, 8]
    true_l = jnp.dot(onehot * logits, maskT,
                     preferred_element_type=jnp.float32)                 # [TB, 8]

    # Per-example per-head cross entropy: logsumexp - true_logit.
    # (max guards log(0) on the padded 8th head column; real heads never hit it
    #  unless their exponentials fully underflow.)
    lse = m + jnp.log(jnp.maximum(sum_e, jnp.float32(1e-30)))            # [TB, 8]
    loss_ref[...] = (lse - true_l).astype(loss_ref.dtype)


def _run_kernel(x, w_pad, b_pad, gcol, tb):
    """x: [B_pad, H], w_pad: [H, NPAD], b_pad: [1, NPAD], gcol: [B_pad, 8]."""
    b_pad_rows = x.shape[0]
    grid = (b_pad_rows // tb,)
    return pl.pallas_call(
        _cls_kernel,
        grid=grid,
        in_specs=[
            pl.BlockSpec((tb, HIDDEN), lambda i: (i, 0)),          # activations
            pl.BlockSpec((HIDDEN, NPAD), lambda i: (0, 0)),        # weights (resident)
            pl.BlockSpec((1, NPAD), lambda i: (0, 0)),             # biases (resident)
            pl.BlockSpec((tb, NUM_HEADS_PAD), lambda i: (i, 0)),   # label columns
        ],
        out_specs=(
            pl.BlockSpec((tb, NPAD), lambda i: (i, 0)),            # lane-dense logits
            pl.BlockSpec((tb, NUM_HEADS_PAD), lambda i: (i, 0)),   # per-example losses
        ),
        out_shape=(
            jax.ShapeDtypeStruct((b_pad_rows, NPAD), jnp.float32),
            jax.ShapeDtypeStruct((b_pad_rows, NUM_HEADS_PAD), jnp.float32),
        ),
        compiler_params=pltpu.CompilerParams(
            dimension_semantics=("parallel",)),                    # megacore on v7x
    )(x, w_pad, b_pad, gcol)


def init_params(key):
    """Deterministic init matching the PyTorch head shapes (7 x Linear(768, c))."""
    params = {}
    for name, c in zip(HEAD_NAMES, HEAD_SIZES):
        key, kw, kb = jax.random.split(key, 3)
        bound_w = (6.0 / (HIDDEN + c)) ** 0.5          # xavier-uniform-ish
        bound_b = 1.0 / (HIDDEN ** 0.5)
        params[name] = {
            "w": jax.random.uniform(kw, (HIDDEN, c), jnp.float32,
                                    -bound_w, bound_w),
            "b": jax.random.uniform(kb, (c,), jnp.float32,
                                    -bound_b, bound_b),
        }
    return params


def fuse_params(params):
    """Fuse the 7 Linear heads into one padded [H, 128] weight + [1, 128] bias.

    Call ONCE (outside the training step); the fused layout is static w.r.t.
    the step, so re-fusing every forward is wasted XLA work.
    """
    w_full = jnp.concatenate([params[n]["w"] for n in HEAD_NAMES], axis=1)  # [H, 20]
    b_full = jnp.concatenate([params[n]["b"] for n in HEAD_NAMES], axis=0)  # [20]
    w_pad = jnp.zeros((HIDDEN, NPAD), jnp.float32).at[:, :TOTAL_CLASSES].set(w_full)
    b_pad = jnp.zeros((1, NPAD), jnp.float32).at[0, :TOTAL_CLASSES].set(b_full)
    return w_pad, b_pad


@functools.partial(jax.jit, static_argnames=("mtl", "block_b", "matmul_dtype"))
def reviewer_forward(hidden_states, labels, fused, mtl=False, block_b=256,
                     matmul_dtype=jnp.bfloat16):
    """Mirrors ReviewerModel_func.cls (non-VIB branch).

    hidden_states: [B, S, H] encoder output (encoder itself is external).
    labels: dict with int32 [B] arrays for keys true_C ... true_severity.
    fused:  (w_pad, b_pad) from fuse_params(params).
    Returns (cvss_C, cvss_I, cvss_A, cvss_AV, cvss_AC, cvss_AU, cvss_severity,
             total_loss, first_hidden).
    """
    w_pad, b_pad = fused
    first_hidden = hidden_states[:, 0, :]                    # [B, H]
    B = first_hidden.shape[0]

    # MXU-native dtype for the matmul (bf16 on v5e/v6e/v7x); accumulate f32.
    x = first_hidden.astype(matmul_dtype)
    w = w_pad.astype(matmul_dtype)

    # Global fused column index of each head's true class: [B, 8] int32.
    gcol = jnp.zeros((B, NUM_HEADS_PAD), jnp.int32)
    for h, name in enumerate(HEAD_NAMES):
        gcol = gcol.at[:, h].set(
            HEAD_OFFSETS[h] + labels["true_" + name].astype(jnp.int32))

    # Batch tile: multiple of 8 (sublanes); 256 aligns to the 128-wide MXU M
    # dim (v5e) and keeps the working set small on v7x's 64 MiB VMEM.
    tb = min(block_b, _round_up(B, 8))
    b_rows = _round_up(B, tb)
    if b_rows != B:
        x = jnp.pad(x, ((0, b_rows - B), (0, 0)))
        gcol = jnp.pad(gcol, ((0, b_rows - B), (0, 0)))

    logits_pad, loss_pe = _run_kernel(x, w, b_pad, gcol, tb)

    logits_pad = logits_pad[:B]
    head_logits = tuple(
        logits_pad[:, off:off + c] for off, c in zip(HEAD_OFFSETS, HEAD_SIZES))

    # Mean over the *real* batch (tiling never changes the mean semantics
    # because losses are emitted per example).
    per_head_loss = jnp.mean(loss_pe[:B, :NUM_HEADS], axis=0)   # [7]
    total_loss = per_head_loss if mtl else jnp.sum(per_head_loss)

    return head_logits + (total_loss, first_hidden)


def _reference(hidden_states, labels, params):
    """Pure-JAX f32 reference of the same forward, for correctness checks."""
    x = hidden_states[:, 0, :].astype(jnp.float32)
    outs, per_head = [], []
    for name in HEAD_NAMES:
        logits = x @ params[name]["w"] + params[name]["b"]
        outs.append(logits)
        logp = jax.nn.log_softmax(logits, axis=-1)
        nll = -jnp.take_along_axis(
            logp, labels["true_" + name][:, None].astype(jnp.int32), axis=-1)
        per_head.append(jnp.mean(nll))
    return outs, jnp.stack(per_head)


if __name__ == "__main__":
    B, S = 2, 8
    key = jax.random.PRNGKey(0)
    k_h, k_p, k_l = jax.random.split(key, 3)

    # Synthetic encoder output (the real encoder is an external submodule).
    hidden_states = jax.random.normal(k_h, (B, S, HIDDEN), jnp.float32)

    params = init_params(k_p)
    fused = fuse_params(params)            # hoisted: fuse once, reuse per step

    labels = {}
    lkeys = jax.random.split(k_l, NUM_HEADS)
    for lk, name, c in zip(lkeys, HEAD_NAMES, HEAD_SIZES):
        labels["true_" + name] = jax.random.randint(lk, (B,), 0, c, jnp.int32)

    ref_logits, ref_per_head = _reference(hidden_states, labels, params)
    ref_total = jnp.sum(ref_per_head)

    # 1) f32 matmul path: tight check against the reference.
    out32 = reviewer_forward(hidden_states, labels, fused, mtl=False,
                             matmul_dtype=jnp.float32)
    out32 = jax.block_until_ready(out32)
    for got, want in zip(out32[:NUM_HEADS], ref_logits):
        assert jnp.allclose(got, want, atol=1e-4, rtol=1e-4), "logits mismatch (f32)"
    assert jnp.allclose(out32[NUM_HEADS], ref_total, atol=1e-4, rtol=1e-4), \
        "loss mismatch (f32)"
    assert out32[-1].shape == (B, HIDDEN)

    # 2) default bf16 MXU path: looser tolerance (bf16 rounding of x, w).
    out16 = reviewer_forward(hidden_states, labels, fused, mtl=False)
    out16 = jax.block_until_ready(out16)
    for got, want in zip(out16[:NUM_HEADS], ref_logits):
        assert jnp.allclose(got, want, atol=5e-2, rtol=5e-2), "logits mismatch (bf16)"
    assert jnp.allclose(out16[NUM_HEADS], ref_total, atol=2e-1, rtol=5e-2), \
        "loss mismatch (bf16)"

    # 3) mtl=True returns the stacked per-head loss vector.
    out_mtl = reviewer_forward(hidden_states, labels, fused, mtl=True,
                               matmul_dtype=jnp.float32)
    out_mtl = jax.block_until_ready(out_mtl)
    assert out_mtl[NUM_HEADS].shape == (NUM_HEADS,)
    assert jnp.allclose(out_mtl[NUM_HEADS], ref_per_head, atol=1e-4, rtol=1e-4), \
        "per-head loss mismatch (mtl)"

    print("KERNEL_OK")
</pallas_src>

<mosaic_0001>
module attributes {stable_mosaic.version = 11 : i64} {
  func.func @_cls_kernel(%arg0: i32, %arg1: memref<8x768xf32, #tpu.memory_space<vmem>>, %arg2: memref<768x128xf32, #tpu.memory_space<vmem>>, %arg3: memref<1x128xf32, #tpu.memory_space<vmem>>, %arg4: memref<8x8xi32, #tpu.memory_space<vmem>>, %arg5: memref<8x128xf32, #tpu.memory_space<vmem>>, %arg6: memref<8x8xf32, #tpu.memory_space<vmem>>) attributes {dimension_semantics = [#tpu.dimension_semantics<parallel>], iteration_bounds = array<i64: 1>, scalar_prefetch = 0 : i64, scratch_operands = 0 : i64, tpu.core_type = #tpu.core_type<tc>, window_params = [{transform_indices = @transform_0, window_bounds = array<i64: 8, 768>}, {pipeline_mode = #tpu.pipeline_mode<synchronous>, transform_indices = @transform_1, window_bounds = array<i64: 768, 128>}, {pipeline_mode = #tpu.pipeline_mode<synchronous>, transform_indices = @transform_2, window_bounds = array<i64: 1, 128>}, {transform_indices = @transform_3, window_bounds = array<i64: 8, 8>}, {transform_indices = @transform_4, window_bounds = array<i64: 8, 128>}, {transform_indices = @transform_5, window_bounds = array<i64: 8, 8>}]} {
    %c0 = arith.constant 0 : index
    %c0_0 = arith.constant 0 : index
    %0 = vector.load %arg1[%c0, %c0_0] : memref<8x768xf32, #tpu.memory_space<vmem>>, vector<8x768xf32>
    %c0_1 = arith.constant 0 : index
    %c0_2 = arith.constant 0 : index
    %1 = vector.load %arg2[%c0_1, %c0_2] : memref<768x128xf32, #tpu.memory_space<vmem>>, vector<768x128xf32>
    %cst = arith.constant dense<0.000000e+00> : vector<8x128xf32>
    %2 = tpu.matmul %0, %1, %cst {dimension_numbers = #tpu.dot_dimension_numbers<[1], [0], [0], [1], [0, 0, 1, 1], [], []>} : vector<8x768xf32>, vector<768x128xf32>, vector<8x128xf32> -> vector<8x128xf32>
    %c0_3 = arith.constant 0 : index
    %c0_4 = arith.constant 0 : index
    %3 = vector.load %arg3[%c0_3, %c0_4] : memref<1x128xf32, #tpu.memory_space<vmem>>, vector<1x128xf32>
    %4 = vector.broadcast %3 : vector<1x128xf32> to vector<8x128xf32>
    %5 = arith.addf %2, %4 : vector<8x128xf32>
    %c0_5 = arith.constant 0 : index
    %c0_6 = arith.constant 0 : index
    %6 = vector.load %arg5[%c0_5, %c0_6] : memref<8x128xf32, #tpu.memory_space<vmem>>, vector<8x128xf32>
    tpu.vector_store %arg5[%c0_5, %c0_6], %5 {strides = array<i32>} : memref<8x128xf32, #tpu.memory_space<vmem>>, vector<8x128xf32>,
    %7 = tpu.iota {dimensions = array<i32: 1>} : vector<8x128xi32>
    %c0_7 = arith.constant 0 : index
    %c0_8 = arith.constant 0 : index
    %8 = vector.load %arg4[%c0_7, %c0_8] : memref<8x8xi32, #tpu.memory_space<vmem>>, vector<8x8xi32>
    %cst_9 = arith.constant 0.000000e+00 : f32
    %9 = vector.broadcast %cst_9 : f32 to vector<8x128xf32>
    %10 = vector.extract_strided_slice %8 {offsets = [0, 0], sizes = [8, 1], strides = [1, 1]} : vector<8x8xi32> to vector<8x1xi32>
    %11 = vector.broadcast %10 : vector<8x1xi32> to vector<8x128xi32>
    %12 = arith.cmpi eq, %7, %11 : vector<8x128xi32>
    %13 = arith.extui %12 : vector<8x128xi1> to vector<8x128xi32>
    %14 = arith.sitofp %13 : vector<8x128xi32> to vector<8x128xf32>
    %15 = arith.addf %9, %14 : vector<8x128xf32>
    %16 = vector.extract_strided_slice %8 {offsets = [0, 1], sizes = [8, 1], strides = [1, 1]} : vector<8x8xi32> to vector<8x1xi32>
    %17 = vector.broadcast %16 : vector<8x1xi32> to vector<8x128xi32>
    %18 = arith.cmpi eq, %7, %17 : vector<8x128xi32>
    %19 = arith.extui %18 : vector<8x128xi1> to vector<8x128xi32>
    %20 = arith.sitofp %19 : vector<8x128xi32> to vector<8x128xf32>
    %21 = arith.addf %15, %20 : vector<8x128xf32>
    %22 = vector.extract_strided_slice %8 {offsets = [0, 2], sizes = [8, 1], strides = [1, 1]} : vector<8x8xi32> to vector<8x1xi32>
    %23 = vector.broadcast %22 : vector<8x1xi32> to vector<8x128xi32>
    %24 = arith.cmpi eq, %7, %23 : vector<8x128xi32>
    %25 = arith.extui %24 : vector<8x128xi1> to vector<8x128xi32>
    %26 = arith.sitofp %25 : vector<8x128xi32> to vector<8x128xf32>
    %27 = arith.addf %21, %26 : vector<8x128xf32>
    %28 = vector.extract_strided_slice %8 {offsets = [0, 3], sizes = [8, 1], strides = [1, 1]} : vector<8x8xi32> to vector<8x1xi32>
    %29 = vector.broadcast %28 : vector<8x1xi32> to vector<8x128xi32>
    %30 = arith.cmpi eq, %7, %29 : vector<8x128xi32>
    %31 = arith.extui %30 : vector<8x128xi1> to vector<8x128xi32>
    %32 = arith.sitofp %31 : vector<8x128xi32> to vector<8x128xf32>
    %33 = arith.addf %27, %32 : vector<8x128xf32>
    %34 = vector.extract_strided_slice %8 {offsets = [0, 4], sizes = [8, 1], strides = [1, 1]} : vector<8x8xi32> to vector<8x1xi32>
    %35 = vector.broadcast %34 : vector<8x1xi32> to vector<8x128xi32>
    %36 = arith.cmpi eq, %7, %35 : vector<8x128xi32>
    %37 = arith.extui %36 : vector<8x128xi1> to vector<8x128xi32>
    %38 = arith.sitofp %37 : vector<8x128xi32> to vector<8x128xf32>
    %39 = arith.addf %33, %38 : vector<8x128xf32>
    %40 = vector.extract_strided_slice %8 {offsets = [0, 5], sizes = [8, 1], strides = [1, 1]} : vector<8x8xi32> to vector<8x1xi32>
    %41 = vector.broadcast %40 : vector<8x1xi32> to vector<8x128xi32>
    %42 = arith.cmpi eq, %7, %41 : vector<8x128xi32>
    %43 = arith.extui %42 : vector<8x128xi1> to vector<8x128xi32>
    %44 = arith.sitofp %43 : vector<8x128xi32> to vector<8x128xf32>
    %45 = arith.addf %39, %44 : vector<8x128xf32>
    %46 = vector.extract_strided_slice %8 {offsets = [0, 6], sizes = [8, 1], strides = [1, 1]} : vector<8x8xi32> to vector<8x1xi32>
    %47 = vector.broadcast %46 : vector<8x1xi32> to vector<8x128xi32>
    %48 = arith.cmpi eq, %7, %47 : vector<8x128xi32>
    %49 = arith.extui %48 : vector<8x128xi1> to vector<8x128xi32>
    %50 = arith.sitofp %49 : vector<8x128xi32> to vector<8x128xf32>
    %51 = arith.addf %45, %50 : vector<8x128xf32>
    %c20_i32 = arith.constant 20 : i32
    %52 = vector.broadcast %c20_i32 : i32 to vector<8x128xi32>
    %53 = arith.cmpi slt, %7, %52 : vector<8x128xi32>
    %cst_10 = arith.constant -1.000000e+30 : f32
    %54 = vector.broadcast %cst_10 : f32 to vector<8x128xf32>
    %55 = arith.select %53, %5, %54 : vector<8x128xi1>, vector<8x128xf32>
    %cst_11 = arith.constant dense<0xFF800000> : vector<8xf32>
    %56 = vector.multi_reduction <maximumf>, %55, %cst_11 [1] : vector<8x128xf32> to vector<8xf32>
    %57 = vector.shape_cast %56 : vector<8xf32> to vector<8x1xf32>
    %58 = vector.broadcast %57 : vector<8x1xf32> to vector<8x128xf32>
    %59 = arith.subf %55, %58 : vector<8x128xf32>
    %60 = math.exp %59 : vector<8x128xf32>
    %61 = tpu.iota {dimensions = array<i32: 0>} : vector<128x8xi32>
    %62 = tpu.iota {dimensions = array<i32: 1>} : vector<128x8xi32>
    %c0_i32 = arith.constant 0 : i32
    %63 = vector.broadcast %c0_i32 : i32 to vector<128x8xi32>
    %c0_i32_12 = arith.constant 0 : i32
    %64 = vector.broadcast %c0_i32_12 : i32 to vector<128x8xi32>
    %c0_i32_13 = arith.constant 0 : i32
    %65 = vector.broadcast %c0_i32_13 : i32 to vector<128x8xi32>
    %66 = arith.cmpi eq, %62, %65 : vector<128x8xi32>
    %c0_i32_14 = arith.constant 0 : i32
    %67 = vector.broadcast %c0_i32_14 : i32 to vector<128x8xi32>
    %68 = arith.select %66, %67, %63 : vector<128x8xi1>, vector<128x8xi32>
    %c0_i32_15 = arith.constant 0 : i32
    %69 = vector.broadcast %c0_i32_15 : i32 to vector<128x8xi32>
    %70 = arith.cmpi eq, %62, %69 : vector<128x8xi32>
    %c3_i32 = arith.constant 3 : i32
    %71 = vector.broadcast %c3_i32 : i32 to vector<128x8xi32>
    %72 = arith.select %70, %71, %64 : vector<128x8xi1>, vector<128x8xi32>
    %c1_i32 = arith.constant 1 : i32
    %73 = vector.broadcast %c1_i32 : i32 to vector<128x8xi32>
    %74 = arith.cmpi eq, %62, %73 : vector<128x8xi32>
    %c3_i32_16 = arith.constant 3 : i32
    %75 = vector.broadcast %c3_i32_16 : i32 to vector<128x8xi32>
    %76 = arith.select %74, %75, %68 : vector<128x8xi1>, vector<128x8xi32>
    %c1_i32_17 = arith.constant 1 : i32
    %77 = vector.broadcast %c1_i32_17 : i32 to vector<128x8xi32>
    %78 = arith.cmpi eq, %62, %77 : vector<128x8xi32>
    %c6_i32 = arith.constant 6 : i32
    %79 = vector.broadcast %c6_i32 : i32 to vector<128x8xi32>
    %80 = arith.select %78, %79, %72 : vector<128x8xi1>, vector<128x8xi32>
    %c2_i32 = arith.constant 2 : i32
    %81 = vector.broadcast %c2_i32 : i32 to vector<128x8xi32>
    %82 = arith.cmpi eq, %62, %81 : vector<128x8xi32>
    %c6_i32_18 = arith.constant 6 : i32
    %83 = vector.broadcast %c6_i32_18 : i32 to vector<128x8xi32>
    %84 = arith.select %82, %83, %76 : vector<128x8xi1>, vector<128x8xi32>
    %c2_i32_19 = arith.constant 2 : i32
    %85 = vector.broadcast %c2_i32_19 : i32 to vector<128x8xi32>
    %86 = arith.cmpi eq, %62, %85 : vector<128x8xi32>
    %c9_i32 = arith.constant 9 : i32
    %87 = vector.broadcast %c9_i32 : i32 to vector<128x8xi32>
    %88 = arith.select %86, %87, %80 : vector<128x8xi1>, vector<128x8xi32>
    %c3_i32_20 = arith.constant 3 : i32
    %89 = vector.broadcast %c3_i32_20 : i32 to vector<128x8xi32>
    %90 = arith.cmpi eq, %62, %89 : vector<128x8xi32>
    %c9_i32_21 = arith.constant 9 : i32
    %91 = vector.broadcast %c9_i32_21 : i32 to vector<128x8xi32>
    %92 = arith.select %90, %91, %84 : vector<128x8xi1>, vector<128x8xi32>
    %c3_i32_22 = arith.constant 3 : i32
    %93 = vector.broadcast %c3_i32_22 : i32 to vector<128x8xi32>
    %94 = arith.cmpi eq, %62, %93 : vector<128x8xi32>
    %c12_i32 = arith.constant 12 : i32
    %95 = vector.broadcast %c12_i32 : i32 to vector<128x8xi32>
    %96 = arith.select %94, %95, %88 : vector<128x8xi1>, vector<128x8xi32>
    %c4_i32 = arith.constant 4 : i32
    %97 = vector.broadcast %c4_i32 : i32 to vector<128x8xi32>
    %98 = arith.cmpi eq, %62, %97 : vector<128x8xi32>
    %c12_i32_23 = arith.constant 12 : i32
    %99 = vector.broadcast %c12_i32_23 : i32 to vector<128x8xi32>
    %100 = arith.select %98, %99, %92 : vector<128x8xi1>, vector<128x8xi32>
    %c4_i32_24 = arith.constant 4 : i32
    %101 = vector.broadcast %c4_i32_24 : i32 to vector<128x8xi32>
    %102 = arith.cmpi eq, %62, %101 : vector<128x8xi32>
    %c15_i32 = arith.constant 15 : i32
    %103 = vector.broadcast %c15_i32 : i32 to vector<128x8xi32>
    %104 = arith.select %102, %103, %96 : vector<128x8xi1>, vector<128x8xi32>
    %c5_i32 = arith.constant 5 : i32
    %105 = vector.broadcast %c5_i32 : i32 to vector<128x8xi32>
    %106 = arith.cmpi eq, %62, %105 : vector<128x8xi32>
    %c15_i32_25 = arith.constant 15 : i32
    %107 = vector.broadcast %c15_i32_25 : i32 to vector<128x8xi32>
    %108 = arith.select %106, %107, %100 : vector<128x8xi1>, vector<128x8xi32>
    %c5_i32_26 = arith.constant 5 : i32
    %109 = vector.broadcast %c5_i32_26 : i32 to vector<128x8xi32>
    %110 = arith.cmpi eq, %62, %109 : vector<128x8xi32>
    %c17_i32 = arith.constant 17 : i32
    %111 = vector.broadcast %c17_i32 : i32 to vector<128x8xi32>
    %112 = arith.select %110, %111, %104 : vector<128x8xi1>, vector<128x8xi32>
    %c6_i32_27 = arith.constant 6 : i32
    %113 = vector.broadcast %c6_i32_27 : i32 to vector<128x8xi32>
    %114 = arith.cmpi eq, %62, %113 : vector<128x8xi32>
    %c17_i32_28 = arith.constant 17 : i32
    %115 = vector.broadcast %c17_i32_28 : i32 to vector<128x8xi32>
    %116 = arith.select %114, %115, %108 : vector<128x8xi1>, vector<128x8xi32>
    %c6_i32_29 = arith.constant 6 : i32
    %117 = vector.broadcast %c6_i32_29 : i32 to vector<128x8xi32>
    %118 = arith.cmpi eq, %62, %117 : vector<128x8xi32>
    %c20_i32_30 = arith.constant 20 : i32
    %119 = vector.broadcast %c20_i32_30 : i32 to vector<128x8xi32>
    %120 = arith.select %118, %119, %112 : vector<128x8xi1>, vector<128x8xi32>
    %121 = arith.cmpi sge, %61, %116 : vector<128x8xi32>
    %122 = arith.cmpi slt, %61, %120 : vector<128x8xi32>
    %123 = arith.andi %121, %122 : vector<128x8xi1>
    %124 = arith.extui %123 : vector<128x8xi1> to vector<128x8xi32>
    %125 = arith.sitofp %124 : vector<128x8xi32> to vector<128x8xf32>
    %cst_31 = arith.constant dense<0.000000e+00> : vector<8x8xf32>
    %126 = tpu.matmul %60, %125, %cst_31 {dimension_numbers = #tpu.dot_dimension_numbers<[1], [0], [0], [1], [0, 0, 1, 1], [], []>} : vector<8x128xf32>, vector<128x8xf32>, vector<8x8xf32> -> vector<8x8xf32>
    %127 = arith.mulf %51, %5 : vector<8x128xf32>
    %cst_32 = arith.constant dense<0.000000e+00> : vector<8x8xf32>
    %128 = tpu.matmul %127, %125, %cst_32 {dimension_numbers = #tpu.dot_dimension_numbers<[1], [0], [0], [1], [0, 0, 1, 1], [], []>} : vector<8x128xf32>, vector<128x8xf32>, vector<8x8xf32> -> vector<8x8xf32>
    %cst_33 = arith.constant 1.000000e-30 : f32
    %129 = vector.broadcast %cst_33 : f32 to vector<8x8xf32>
    %130 = arith.maximumf %126, %129 : vector<8x8xf32>
    %131 = math.log %130 : vector<8x8xf32>
    %132 = vector.broadcast %57 : vector<8x1xf32> to vector<8x8xf32>
    %133 = arith.addf %132, %131 : vector<8x8xf32>
    %134 = arith.subf %133, %128 : vector<8x8xf32>
    %c0_34 = arith.constant 0 : index
    %c0_35 = arith.constant 0 : index
    %135 = vector.load %arg6[%c0_34, %c0_35] : memref<8x8xf32, #tpu.memory_space<vmem>>, vector<8x8xf32>
    tpu.vector_store %arg6[%c0_34, %c0_35], %134 {strides = array<i32>} : memref<8x8xf32, #tpu.memory_space<vmem>>, vector<8x8xf32>,
    return
  }
  func.func @transform_0(%arg0: i32) -> (i32, i32) {
    %c0_i32 = arith.constant 0 : i32
    %c0_i32_0 = arith.constant 0 : i32
    return %arg0, %c0_i32 : i32, i32
  }
  func.func @transform_1(%arg0: i32) -> (i32, i32) {
    %c0_i32 = arith.constant 0 : i32
    %c0_i32_0 = arith.constant 0 : i32
    %c0_i32_1 = arith.constant 0 : i32
    return %c0_i32, %c0_i32_0 : i32, i32
  }
  func.func @transform_2(%arg0: i32) -> (i32, i32) {
    %c0_i32 = arith.constant 0 : i32
    %c0_i32_0 = arith.constant 0 : i32
    %c0_i32_1 = arith.constant 0 : i32
    return %c0_i32, %c0_i32_0 : i32, i32
  }
  func.func @transform_3(%arg0: i32) -> (i32, i32) {
    %c0_i32 = arith.constant 0 : i32
    %c0_i32_0 = arith.constant 0 : i32
    return %arg0, %c0_i32 : i32, i32
  }
  func.func @transform_4(%arg0: i32) -> (i32, i32) {
    %c0_i32 = arith.constant 0 : i32
    %c0_i32_0 = arith.constant 0 : i32
    return %arg0, %c0_i32 : i32, i32
  }
  func.func @transform_5(%arg0: i32) -> (i32, i32) {
    %c0_i32 = arith.constant 0 : i32
    %c0_i32_0 = arith.constant 0 : i32
    return %arg0, %c0_i32 : i32, i32
  }
}

</mosaic_0001>

<bundles_post_ra>
// kernel: reviewer_forward.1
= control target key start
LH: loop header
LB: loop body
LE: loop exit
PB: predicated region body
PF: predicated region fallthrough
CT: control target
= control target key end

     0   :  { %11 = vsyncpa [#allocation3], 0  ;;  %s1145_s18 = smov [#allocation2]   ;;  %s1373_s0 = inlined_call_operand.vmem [shape: f32[8,768], index: 0, kind: input, shape index: {}]   ;;  %s1374_s1 = inlined_call_operand.hbm [shape: f32[768,128], index: 1, kind: input, shape index: {}]   ;;  %s1375_s2 = inlined_call_operand.vmem [shape: f32[1,128], index: 2, kind: input, shape index: {}]   ;;  %s1376_s3 = inlined_call_operand.vmem [shape: s32[8,8], index: 3, kind: input, shape index: {}]   ;;  %s1377_s4 = inlined_call_operand.vmem [shape: f32[8,128], index: 4, kind: output, shape index: {0}]   ;;  %s1378_s5 = inlined_call_operand.vmem [shape: f32[8,8], index: 5, kind: output, shape index: {1}]  }
   0x1   :  { %s19_s19 = sshll.u32 %s1145_s18, 4  ;;  %s1121_s22 = scalar_lea.hbm %s1374_s1, 12288  ;;  %s20_s19 = int_to_ptr.vmem [resolvable:$true] %s19_s19 }
   0x2   :  { %p1122_p0 = scmp.ne.s32.totalorder %s1374_s1, %s1121_s22  ;;  %p1125_p1 = scmp.lt.u32.totalorder %s1121_s22, %s1374_s1 }
   0x4   :  { %p1127_p2 = pnand %p1125_p1, %p1122_p0 }
   0x6   :  { %1130 = shalt.err (!%p1127_p2)
}
   0x7   :  { %s1131_s27 = scalar_lea.vmem %s20_s19, 12288  ;;  %p1136_p4 = scmp.lt.s32.totalorder %s20_s19, %s20_s19 }
   0x8   :  { %p1132_p3 = scmp.ne.s32.totalorder %s20_s19, %s1131_s27  ;;  %p1137_p5 = scmp.lt.s32.totalorder %s1131_s27, %s1131_s27 }
   0xa   :  { %p1138_p6 = por %p1137_p5, %p1136_p4 }
   0xc   :  { %p1139_p7 = pnand %p1138_p6, %p1132_p3 }
   0xe   :  { %1142 = shalt.err (!%p1139_p7)
}
   0xf   :  { %s1146_s28 = smov 128   ;;  %s1147_s29 = smov 8  }
  0x10   :  { %25 = dma.hbm_to_vmem [thread:$0]  %s1374_s1, 12288, %s20_s19, [#allocation3], %s1146_s28, %s1146_s28, %s1147_s29  }
  0x11   :  { %1143 = dma.done.wait [#allocation3], 12288  }
  0x12   :  { %1144 = vsyncadd [#allocation3], 4294955008  ;;  %v55_v0 = vld [vmem:[#allocation2 + $0x80] sm:$0xff]  ;;  %v56_v1 = vld [vmem:[#allocation2 + $0x88] sm:$0xff] }
  0x13   :  { %v39_v2 = vld [vmem:[#allocation2] sm:$0xff]  ;;  %v951_v3 = vpack.c.bf16 %v56_v1, %v55_v0  ;;  %v40_v4 = vld [vmem:[#allocation2 + $0x8] sm:$0xff]  ;;  %v57_v11 = vld [vmem:[#allocation2 + $0x90] sm:$0xff] }
  0x14   :  { %v87_v5 = vld [vmem:[#allocation2 + $0x180] sm:$0xff]  ;;  %v88_v6 = vld [vmem:[#allocation2 + $0x188] sm:$0xff]  ;;  %v953_v7 = vpack.c.bf16 %v40_v4, %v39_v2  ;;  %v58_v13 = vld [vmem:[#allocation2 + $0x98] sm:$0xff] }
  0x15   :  { %v983_v8 = vpack.c.bf16 %v88_v6, %v87_v5  ;;  %v71_v9 = vld [vmem:[#allocation2 + $0x100] sm:$0xff]  ;;  %v72_v10 = vld [vmem:[#allocation2 + $0x108] sm:$0xff]  ;;  %952 = vmatprep.subr.bf16.mxu0 %v951_v3  ;;  %v41_v14 = vld [vmem:[#allocation2 + $0x10] sm:$0xff]  ;;  %v955_v16 = vpack.c.bf16 %v58_v13, %v57_v11 }
  0x16   :  { %v985_v12 = vpack.c.bf16 %v72_v10, %v71_v9  ;;  %v42_v15 = vld [vmem:[#allocation2 + $0x18] sm:$0xff]  ;;  %954 = vmatpush3.bf16.msra.mxu0 %v953_v7  ;;  %v89_v18 = vld [vmem:[#allocation2 + $0x190] sm:$0xff]  ;;  %v59_v23 = vld [vmem:[#allocation2 + $0xa0] sm:$0xff] }
  0x17   :  { %984 = vmatprep.subr.bf16.mxu1 %v983_v8  ;;  %v957_v17 = vpack.c.bf16 %v42_v15, %v41_v14  ;;  %v90_v19 = vld [vmem:[#allocation2 + $0x198] sm:$0xff]  ;;  %v73_v20 = vld [vmem:[#allocation2 + $0x110] sm:$0xff]  ;;  %v60_v24 = vld [vmem:[#allocation2 + $0xa8] sm:$0xff]  ;;  %956 = vmatprep.subr.bf16.mxu0 %v955_v16 }
  0x18   :  { %986 = vmatpush3.bf16.msra.mxu1 %v985_v12  ;;  %v987_v21 = vpack.c.bf16 %v90_v19, %v89_v18  ;;  %v74_v22 = vld [vmem:[#allocation2 + $0x118] sm:$0xff]  ;;  %v959_v26 = vpack.c.bf16 %v60_v24, %v59_v23  ;;  %v43_v27 = vld [vmem:[#allocation2 + $0x20] sm:$0xff]  ;;  %v44_v28 = vld [vmem:[#allocation2 + $0x28] sm:$0xff] }
  0x19   :  { %v989_v25 = vpack.c.bf16 %v74_v22, %v73_v20  ;;  %v91_v29 = vld [vmem:[#allocation2 + $0x1a0] sm:$0xff]  ;;  %v92_v30 = vld [vmem:[#allocation2 + $0x1a8] sm:$0xff]  ;;  %v961_v33 = vpack.c.bf16 %v44_v28, %v43_v27  ;;  %v61_v35 = vld [vmem:[#allocation2 + $0xb0] sm:$0xff] }
  0x1a   :  { %988 = vmatprep.subr.bf16.mxu1 %v987_v21  ;;  %v75_v31 = vld [vmem:[#allocation2 + $0x120] sm:$0xff]  ;;  %v76_v32 = vld [vmem:[#allocation2 + $0x128] sm:$0xff]  ;;  %958 = vmatpush3.bf16.msra.mxu0 %v957_v17  ;;  %v991_v34 = vpack.c.bf16 %v92_v30, %v91_v29  ;;  %v62_v36 = vld [vmem:[#allocation2 + $0xb8] sm:$0xff] }
  0x1b   :  { %v45_v37 = vld [vmem:[#allocation2 + $0x30] sm:$0xff]  ;;  %960 = vmatprep.subr.bf16.mxu0 %v959_v26  ;;  %v993_v38 = vpack.c.bf16 %v76_v32, %v75_v31  ;;  %v963_v39 = vpack.c.bf16 %v62_v36, %v61_v35  ;;  %v46_v40 = vld [vmem:[#allocation2 + $0x38] sm:$0xff]  ;;  %v63_v46 = vld [vmem:[#allocation2 + $0xc0] sm:$0xff] }
  0x1c   :  { %990 = vmatpush3.bf16.msra.mxu1 %v989_v25  ;;  %v93_v41 = vld [vmem:[#allocation2 + $0x1b0] sm:$0xff]  ;;  %v94_v42 = vld [vmem:[#allocation2 + $0x1b8] sm:$0xff]  ;;  %v64_v47 = vld [vmem:[#allocation2 + $0xc8] sm:$0xff]  ;;  %v965_v48 = vpack.c.bf16 %v46_v40, %v45_v37 }
  0x1d   :  { %992 = vmatprep.subr.bf16.mxu1 %v991_v34  ;;  %v995_v43 = vpack.c.bf16 %v94_v42, %v93_v41  ;;  %v77_v44 = vld [vmem:[#allocation2 + $0x130] sm:$0xff]  ;;  %v78_v45 = vld [vmem:[#allocation2 + $0x138] sm:$0xff]  ;;  %v95_v49 = vld [vmem:[#allocation2 + $0x1c0] sm:$0xff]  ;;  %v967_v52 = vpack.c.bf16 %v64_v47, %v63_v46 }
  0x1e   :  { %962 = vmatpush3.bf16.msra.mxu0 %v961_v33  ;;  %v96_v50 = vld [vmem:[#allocation2 + $0x1c8] sm:$0xff]  ;;  %v997_v51 = vpack.c.bf16 %v78_v45, %v77_v44  ;;  %v47_v53 = vld [vmem:[#allocation2 + $0x40] sm:$0xff]  ;;  %v65_v58 = vld [vmem:[#allocation2 + $0xd0] sm:$0xff] }
  0x1f   :  { %964 = vmatprep.subr.bf16.mxu0 %v963_v39  ;;  %v48_v54 = vld [vmem:[#allocation2 + $0x48] sm:$0xff]  ;;  %v79_v55 = vld [vmem:[#allocation2 + $0x140] sm:$0xff]  ;;  %v999_v56 = vpack.c.bf16 %v96_v50, %v95_v49  ;;  %v66_v59 = vld [vmem:[#allocation2 + $0xd8] sm:$0xff] }
  0x20   :  { %994 = vmatpush3.bf16.msra.mxu1 %v993_v38  ;;  %v80_v57 = vld [vmem:[#allocation2 + $0x148] sm:$0xff]  ;;  %v97_v60 = vld [vmem:[#allocation2 + $0x1d0] sm:$0xff]  ;;  %v98_v61 = vld [vmem:[#allocation2 + $0x1d8] sm:$0xff]  ;;  %v969_v62 = vpack.c.bf16 %v48_v54, %v47_v53  ;;  %v971_v0 = vpack.c.bf16 %v66_v59, %v65_v58 }
  0x21   :  { %996 = vmatprep.subr.bf16.mxu1 %v995_v43  ;;  %v1001_v63 = vpack.c.bf16 %v80_v57, %v79_v55  ;;  %v49_v1 = vld [vmem:[#allocation2 + $0x50] sm:$0xff]  ;;  %v50_v2 = vld [vmem:[#allocation2 + $0x58] sm:$0xff]  ;;  %v1003_v4 = vpack.c.bf16 %v98_v61, %v97_v60  ;;  %v67_v6 = vld [vmem:[#allocation2 + $0xe0] sm:$0xff] }
  0x22   :  { %966 = vmatpush3.bf16.msra.mxu0 %v965_v48  ;;  %v81_v3 = vld [vmem:[#allocation2 + $0x150] sm:$0xff]  ;;  %v82_v5 = vld [vmem:[#allocation2 + $0x158] sm:$0xff]  ;;  %v68_v7 = vld [vmem:[#allocation2 + $0xe8] sm:$0xff]  ;;  %v973_v10 = vpack.c.bf16 %v50_v2, %v49_v1 }
  0x23   :  { %968 = vmatprep.subr.bf16.mxu0 %v967_v52  ;;  %v99_v8 = vld [vmem:[#allocation2 + $0x1e0] sm:$0xff]  ;;  %v100_v9 = vld [vmem:[#allocation2 + $0x1e8] sm:$0xff]  ;;  %v1005_v13 = vpack.c.bf16 %v82_v5, %v81_v3  ;;  %v975_v14 = vpack.c.bf16 %v68_v7, %v67_v6  ;;  %v69_v19 = vld [vmem:[#allocation2 + $0xf0] sm:$0xff] }
  0x24   :  { %998 = vmatpush3.bf16.msra.mxu1 %v997_v51  ;;  %v51_v11 = vld [vmem:[#allocation2 + $0x60] sm:$0xff]  ;;  %v34_v12 = vld [vmem:[%s1373_s0 + $0x8] sm:$0xff]  ;;  %v1007_v18 = vpack.c.bf16 %v100_v9, %v99_v8  ;;  %v70_v20 = vld [vmem:[#allocation2 + $0xf8] sm:$0xff] }
  0x25   :  { %1000 = vmatprep.subr.bf16.mxu1 %v999_v56  ;;  %v52_v15 = vld [vmem:[#allocation2 + $0x68] sm:$0xff]  ;;  %v83_v16 = vld [vmem:[#allocation2 + $0x160] sm:$0xff]  ;;  %206 = vmatprep.mubr.f32.mxu0 %v34_v12  ;;  %v36_v21 = vld [vmem:[%s1373_s0 + $0x18] sm:$0xff]  ;;  %v979_v26 = vpack.c.bf16 %v70_v20, %v69_v19 }
  0x26   :  { %970 = vmatpush3.bf16.msra.mxu0 %v969_v62  ;;  %v84_v17 = vld [vmem:[#allocation2 + $0x168] sm:$0xff]  ;;  %v101_v22 = vld [vmem:[#allocation2 + $0x1f0] sm:$0xff]  ;;  %v102_v23 = vld [vmem:[#allocation2 + $0x1f8] sm:$0xff]  ;;  %276 = vmatprep.mubr.f32.mxu1 %v36_v21  ;;  %v977_v24 = vpack.c.bf16 %v52_v15, %v51_v11 }
  0x27   :  { %972 = vmatprep.subr.bf16.mxu0 %v971_v0  ;;  %v1009_v25 = vpack.c.bf16 %v84_v17, %v83_v16  ;;  %v53_v27 = vld [vmem:[#allocation2 + $0x70] sm:$0xff]  ;;  %v54_v28 = vld [vmem:[#allocation2 + $0x78] sm:$0xff]  ;;  %v1011_v30 = vpack.c.bf16 %v102_v23, %v101_v22  ;;  %v119_v32 = vld [vmem:[#allocation2 + $0x280] sm:$0xff]  ;;  %v353_v22 = vlaneseq }
  0x28   :  { %1002 = vmatpush3.bf16.msra.mxu1 %v1001_v63  ;;  %v85_v29 = vld [vmem:[#allocation2 + $0x170] sm:$0xff]  ;;  %v86_v31 = vld [vmem:[#allocation2 + $0x178] sm:$0xff]  ;;  %v120_v33 = vld [vmem:[#allocation2 + $0x288] sm:$0xff]  ;;  %v981_v34 = vpack.c.bf16 %v54_v28, %v53_v27 }
  0x29   :  { %1004 = vmatprep.subr.bf16.mxu1 %v1003_v4  ;;  %v1013_v35 = vpack.c.bf16 %v86_v31, %v85_v29  ;;  %v1015_v36 = vpack.c.bf16 %v120_v33, %v119_v32  ;;  %v103_v37 = vld [vmem:[#allocation2 + $0x200] sm:$0xff]  ;;  %v104_v38 = vld [vmem:[#allocation2 + $0x208] sm:$0xff]  ;;  %v121_v39 = vld [vmem:[#allocation2 + $0x290] sm:$0xff]  ;;  %v1219_v23 = vand.u32 127, %v353_v22  ;;  %v1151_v33 = vmov 3  }
  0x2a   :  { %974 = vmatpush3.bf16.msra.mxu0 %v973_v10  ;;  %v122_v40 = vld [vmem:[#allocation2 + $0x298] sm:$0xff]  ;;  %v33_v41 = vld [vmem:[%s1373_s0] sm:$0xff]  ;;  %v1017_v42 = vpack.c.bf16 %v104_v38, %v103_v37  ;;  %v35_v43 = vld [vmem:[%s1373_s0 + $0x10] sm:$0xff]  ;;  %v1152_v38 = vmov 4  }
  0x2b   :  { %976 = vmatprep.subr.bf16.mxu0 %v975_v14  ;;  %v1019_v44 = vpack.c.bf16 %v122_v40, %v121_v39  ;;  %v105_v45 = vld [vmem:[#allocation2 + $0x210] sm:$0xff]  ;;  %v106_v46 = vld [vmem:[#allocation2 + $0x218] sm:$0xff]  ;;  %v123_v47 = vld [vmem:[#allocation2 + $0x2a0] sm:$0xff]  ;;  %vm429_vm0 = vcmp.eq.s32.totalorder %v1219_v23, 0  ;;  %vm431_vm1 = vcmp.eq.s32.totalorder %v1219_v23, 1  ;;  %vm434_vm2 = vcmp.eq.s32.totalorder %v1219_v23, 2 }
  0x2c   :  { %1006 = vmatpush3.bf16.msra.mxu1 %v1005_v13  ;;  %v124_v48 = vld [vmem:[#allocation2 + $0x2a8] sm:$0xff]  ;;  %v1021_v50 = vpack.c.bf16 %v106_v46, %v105_v45  ;;  %v107_v52 = vld [vmem:[#allocation2 + $0x220] sm:$0xff]  ;;  %v125_v54 = vld [vmem:[#allocation2 + $0x2b0] sm:$0xff]  ;;  %vm437_vm3 = vcmp.eq.s32.totalorder %v1219_v23, 3  ;;  %vm440_vm4 = vcmp.eq.s32.totalorder %v1219_v23, 4  ;;  %vm443_vm5 = vcmp.eq.s32.totalorder %v1219_v23, 5 }
  0x2d   :  { %1008 = vmatprep.subr.bf16.mxu1 %v1007_v18  ;;  %v38_v49 = vld [vmem:[%s1373_s0 + $0x28] sm:$0xff]  ;;  %v1023_v51 = vpack.c.bf16 %v124_v48, %v123_v47  ;;  %v126_v55 = vld [vmem:[#allocation2 + $0x2b8] sm:$0xff]  ;;  %v109_v58 = vld [vmem:[#allocation2 + $0x230] sm:$0xff]  ;;  %vm446_vm6 = vcmp.eq.s32.totalorder %v1219_v23, 6  ;;  %v1153_v45 = vmov 5   ;;  %v1154_v46 = vmov 0.0|0.0  }
  0x2e   :  { %978 = vmatpush3.bf16.msra.mxu0 %v977_v24  ;;  %v108_v53 = vld [vmem:[#allocation2 + $0x228] sm:$0xff]  ;;  %v1027_v57 = vpack.c.bf16 %v126_v55, %v125_v54  ;;  %v110_v59 = vld [vmem:[#allocation2 + $0x238] sm:$0xff]  ;;  %v127_v60 = vld [vmem:[#allocation2 + $0x2c0] sm:$0xff] }
  0x2f   :  { %980 = vmatprep.subr.bf16.mxu0 %v979_v26  ;;  %v1025_v56 = vpack.c.bf16 %v108_v53, %v107_v52  ;;  %v128_v61 = vld [vmem:[#allocation2 + $0x2c8] sm:$0xff]  ;;  %v1029_v62 = vpack.c.bf16 %v110_v59, %v109_v58  ;;  %v111_v0 = vld [vmem:[#allocation2 + $0x240] sm:$0xff]  ;;  %v129_v2 = vld [vmem:[#allocation2 + $0x2d0] sm:$0xff]  ;;  %v1149_v26 = vmov 0   ;;  %v1155_v53 = vmov 1.0|1.0  }
  0x30   :  { %1010 = vmatpush3.bf16.msra.mxu1 %v1009_v25  ;;  %v1031_v63 = vpack.c.bf16 %v128_v61, %v127_v60  ;;  %v112_v1 = vld [vmem:[#allocation2 + $0x248] sm:$0xff]  ;;  %v130_v3 = vld [vmem:[#allocation2 + $0x2d8] sm:$0xff]  ;;  %v113_v6 = vld [vmem:[#allocation2 + $0x250] sm:$0xff]  ;;  %v1148_v25 = vmov 1   ;;  %1109 = vset.pattern.permute.xlu0 %v1149_v26  ;;  %v430_v27 = vsel %vm429_vm0, 3, %v1149_v26  ;;  %v432_v28 = vsel %vm431_vm1, 3, %v1149_v26 }
  0x31   :  { %1012 = vmatprep.subr.bf16.mxu1 %v1011_v30  ;;  %v1033_v4 = vpack.c.bf16 %v112_v1, %v111_v0  ;;  %v1035_v5 = vpack.c.bf16 %v130_v3, %v129_v2  ;;  %v114_v7 = vld [vmem:[#allocation2 + $0x258] sm:$0xff]  ;;  %v131_v8 = vld [vmem:[#allocation2 + $0x2e0] sm:$0xff]  ;;  %v132_v9 = vld [vmem:[#allocation2 + $0x2e8] sm:$0xff]  ;;  %1110 = vset.pattern.permute.xlu1 %v1148_v25  ;;  %v433_v29 = vsel %vm431_vm1, 6, %v430_v27  ;;  %v1150_v30 = vmov 2  }
  0x32   :  { %982 = vmatpush3.bf16.msra.mxu0 %v981_v34  ;;  %v1037_v10 = vpack.c.bf16 %v114_v7, %v113_v6  ;;  %v1039_v11 = vpack.c.bf16 %v132_v9, %v131_v8  ;;  %v115_v12 = vld [vmem:[#allocation2 + $0x260] sm:$0xff]  ;;  %v116_v13 = vld [vmem:[#allocation2 + $0x268] sm:$0xff]  ;;  %v133_v14 = vld [vmem:[#allocation2 + $0x2f0] sm:$0xff]  ;;  %v435_v31 = vsel %vm434_vm2, 6, %v432_v28  ;;  %v436_v32 = vsel %vm434_vm2, 9, %v433_v29 }
  0x33   :  { %1016 = vmatprep.subr.bf16.mxu0 %v1015_v36  ;;  %v134_v15 = vld [vmem:[#allocation2 + $0x2f8] sm:$0xff]  ;;  %v1041_v16 = vpack.c.bf16 %v116_v13, %v115_v12  ;;  %v117_v18 = vld [vmem:[#allocation2 + $0x270] sm:$0xff]  ;;  %v37_v21 = vld [vmem:[%s1373_s0 + $0x20] sm:$0xff]  ;;  %v438_v34 = vsel %vm437_vm3, 9, %v435_v31 }
  0x34   :  { %1014 = vmatpush3.bf16.msra.mxu1 %v1013_v35  ;;  %v1043_v17 = vpack.c.bf16 %v134_v15, %v133_v14  ;;  %v118_v19 = vld [vmem:[#allocation2 + $0x278] sm:$0xff]  ;;  %v1224_v24 = vld [vmem:[%s1376_s3] sm:$0xff]  ;;  %v439_v35 = vsel %vm437_vm3, 12, %v436_v32  ;;  %v441_v36 = vsel %vm440_vm4, 12, %v438_v34 }
  0x35   :  { %207 = vmatmul.mubr.f32.vlgmr.msra.gmra.mrb[0].mxu0 %v33_v41  ;;  %v1045_v20 = vpack.c.bf16 %v118_v19, %v117_v18  ;;  %364 = vperm.xlu1 %1110, %v1224_v24   ;;  %v442_v37 = vsel %vm440_vm4, 15, %v439_v35  ;;  %v444_v39 = vsel %vm443_vm5, 15, %v441_v36  ;;  %v1237_v41 = vshrl.u32 %v353_v22, 7  ;;  %v686_v58 = vld [vmem:[%s1375_s2] ss:$0 sm:$0xff] }
  0x36   :  { %1018 = vmatpush3.bf16.msra.mxu0 %v1017_v42  ;;  %346 = vmatprep.mubr.f32.mxu0 %v38_v49  ;;  %v445_v40 = vsel %vm443_vm5, 17, %v442_v37  ;;  %v1239_v42 = vsel %vm446_vm6, 17, %v444_v39 }
  0x37   :  { %277 = vmatmul.mubr.f32.vlgmr.msra.gmra.mrb[0].mxu1 %v35_v43  ;;  %1020 = vmatprep.subr.bf16.mxu0 %v1019_v44  ;;  %v1241_v43 = vsel %vm446_vm6, 20, %v445_v40  ;;  %v414_v44 = vadd.s32 8, %v1237_v41  ;;  %vm449_vm7 = vcmp.ge.s32.totalorder %v1237_v41, %v1239_v42  ;;  %v415_v47 = vadd.s32 16, %v1237_v41 }
  0x38   :  { %1047 = vmatprep.subr.bf16.mxu1 %v1154_v46  ;;  %vm465_vm8 = vcmp.lt.s32.totalorder %v1237_v41, %v1241_v43  ;;  %v416_v49 = vadd.s32 24, %v1237_v41  ;;  %v419_v52 = vadd.s32 48, %v1237_v41  ;;  %v420_v55 = vadd.s32 56, %v1237_v41 }
  0x39   :  { %1111 = vset.pattern.permute.xlu1 %v1150_v30  ;;  %vm450_vm9 = vcmp.ge.s32.totalorder %v414_v44, %v1239_v42  ;;  %vm466_vm10 = vcmp.lt.s32.totalorder %v414_v44, %v1241_v43  ;;  %vm1253_vm11 = vmand %vm449_vm7, %vm465_vm8  ;;  %vm451_vm13 = vcmp.ge.s32.totalorder %v415_v47, %v1239_v42  ;;  %vm467_vm14 = vcmp.lt.s32.totalorder %v415_v47, %v1241_v43 }
  0x3a   :  { %1022 = vmatpush3.bf16.msra.mxu0 %v1021_v50  ;;  %371 = vperm.xlu1 %1111, %v1224_v24   ;;  %v417_v50 = vadd.s32 32, %v1237_v41  ;;  %vm482_vm12 = vmand %vm450_vm9, %vm466_vm10  ;;  %vm452_vm0 = vcmp.ge.s32.totalorder %v416_v49, %v1239_v42  ;;  %vm468_vm1 = vcmp.lt.s32.totalorder %v416_v49, %v1241_v43  ;;  %vm455_vm10 = vcmp.ge.s32.totalorder %v419_v52, %v1239_v42 }
  0x3b   :  { %1024 = vmatprep.subr.bf16.mxu0 %v1023_v51  ;;  %v418_v51 = vadd.s32 40, %v1237_v41  ;;  %vm1048_vm15 = vmpackc.low %vm482_vm12, %vm1253_vm11  ;;  %vm471_vm11 = vcmp.lt.s32.totalorder %v419_v52, %v1241_v43  ;;  %v421_v7 = vadd.s32 64, %v1237_v41  ;;  %v422_v8 = vadd.s32 72, %v1237_v41 }
  0x3c   :  { %1049 = vmatpush3.bf16.msk.msra.mxu1 %vm1048_vm15, %v1155_v53  ;;  %vm1269_vm2 = vmand %vm451_vm13, %vm467_vm14  ;;  %vm453_vm3 = vcmp.ge.s32.totalorder %v417_v50, %v1239_v42  ;;  %vm469_vm4 = vcmp.lt.s32.totalorder %v417_v50, %v1241_v43  ;;  %vm456_vm13 = vcmp.ge.s32.totalorder %v420_v55, %v1239_v42  ;;  %vm472_vm14 = vcmp.lt.s32.totalorder %v420_v55, %v1241_v43 }
  0x3d   :  { %1050 = vmatprep.subr.bf16.mxu1 %v1154_v46  ;;  %vm484_vm5 = vmand %vm452_vm0, %vm468_vm1  ;;  %vm454_vm6 = vcmp.ge.s32.totalorder %v418_v51, %v1239_v42  ;;  %vm470_vm7 = vcmp.lt.s32.totalorder %v418_v51, %v1241_v43  ;;  %v423_v9 = vadd.s32 80, %v1237_v41  ;;  %v426_v12 = vadd.s32 104, %v1237_v41 }
  0x3e   :  { %1026 = vmatpush3.bf16.msra.mxu0 %v1025_v56  ;;  %1112 = vset.pattern.permute.xlu1 %v1151_v33  ;;  %v1156_v56 = vmov 6   ;;  %vm1051_vm8 = vmpackc.low %vm484_vm5, %vm1269_vm2  ;;  %vm458_vm5 = vcmp.ge.s32.totalorder %v422_v8, %v1239_v42  ;;  %v427_v14 = vadd.s32 112, %v1237_v41  ;;  %v428_v15 = vadd.s32 120, %v1237_v41 }
  0x3f   :  { %1028 = vmatprep.subr.bf16.mxu0 %v1027_v57  ;;  %378 = vperm.xlu1 %1112, %v1224_v24   ;;  %vm485_vm9 = vmand %vm453_vm3, %vm469_vm4  ;;  %vm405_vm3 = vcmp.lt.s32.totalorder %v1219_v23, 20  ;;  %vm457_vm4 = vcmp.ge.s32.totalorder %v421_v7, %v1239_v42 }
  0x40   :  { %1052 = vmatpush3.bf16.msk.msra.mxu1 %vm1051_vm8, %v1155_v53  ;;  %vm486_vm12 = vmand %vm454_vm6, %vm470_vm7  ;;  %vm473_vm6 = vcmp.lt.s32.totalorder %v421_v7, %v1241_v43  ;;  %vm474_vm7 = vcmp.lt.s32.totalorder %v422_v8, %v1241_v43 }
  0x41   :  { %1053 = vmatprep.subr.bf16.mxu1 %v1154_v46  ;;  %vm487_vm0 = vmand %vm455_vm10, %vm471_vm11  ;;  %vm459_vm11 = vcmp.ge.s32.totalorder %v423_v9, %v1239_v42 }
  0x42   :  { %1030 = vmatpush3.bf16.msra.mxu0 %v1029_v62  ;;  %vm488_vm1 = vmand %vm456_vm13, %vm472_vm14  ;;  %vm475_vm13 = vcmp.lt.s32.totalorder %v423_v9, %v1241_v43 }
  0x43   :  { %1032 = vmatprep.subr.bf16.mxu0 %v1031_v63  ;;  %1113 = vset.pattern.permute.xlu1 %v1152_v38  ;;  %vm1057_vm2 = vmpackc.low %vm488_vm1, %vm487_vm0 }
  0x44   :  { %385 = vperm.xlu1 %1113, %v1224_v24  }
  0x46   :  { %1034 = vmatpush3.bf16.msra.mxu0 %v1033_v4 }
  0x47   :  { %1036 = vmatprep.subr.bf16.mxu0 %v1035_v5 }
  0x48   :  { %1114 = vset.pattern.permute.xlu1 %v1153_v45 }
  0x49   :  { %392 = vperm.xlu1 %1114, %v1224_v24  }
  0x4a   :  { %1038 = vmatpush3.bf16.msra.mxu0 %v1037_v10  ;;  %v424_v10 = vadd.s32 88, %v1237_v41 }
  0x4b   :  { %1040 = vmatprep.subr.bf16.mxu0 %v1039_v11  ;;  %v425_v11 = vadd.s32 96, %v1237_v41 }
  0x4c   :  { %vm476_vm14 = vcmp.lt.s32.totalorder %v424_v10, %v1241_v43 }
  0x4d   :  { %1115 = vset.pattern.permute.xlu1 %v1156_v56 }
  0x4e   :  { %1042 = vmatpush3.bf16.msra.mxu0 %v1041_v16  ;;  %399 = vperm.xlu1 %1115, %v1224_v24   ;;  %v1158_v16 = vmov 0.0  }
  0x4f   :  { %1044 = vmatprep.subr.bf16.mxu0 %v1043_v17 }
  0x52   :  { %1046 = vmatpush3.bf16.msra.mxu0 %v1045_v20 }
  0x53   :  { %1071 = vmatprep.subr.bf16.mxu0 %v1154_v46 }
  0x55   :  { %347 = vmatmul.mubr.f32.vlgmr.msra.gmra.mrb[2].mxu0 %v37_v21 }
  0x56   :  { %1073 = vmatpush3.bf16.msk.msra.mxu0 %vm1048_vm15, %v1155_v53  ;;  %vm1054_vm15 = vmpackc.low %vm486_vm12, %vm485_vm9  ;;  %vm460_vm12 = vcmp.ge.s32.totalorder %v424_v10, %v1239_v42 }
  0x57   :  { %1074 = vmatprep.subr.bf16.mxu0 %v1154_v46  ;;  %1055 = vmatpush3.bf16.msk.msra.mxu1 %vm1054_vm15, %v1155_v53  ;;  %vm490_vm9 = vmand %vm458_vm5, %vm474_vm7  ;;  %vm478_vm5 = vcmp.lt.s32.totalorder %v426_v12, %v1241_v43 }
  0x58   :  { %1056 = vmatprep.subr.bf16.mxu1 %v1154_v46  ;;  %vm492_vm0 = vmand %vm460_vm12, %vm476_vm14  ;;  %vm480_vm12 = vcmp.lt.s32.totalorder %v428_v15, %v1241_v43 }
  0x5a   :  { %1076 = vmatpush3.bf16.msk.msra.mxu0 %vm1051_vm8, %v1155_v53  ;;  %vm489_vm8 = vmand %vm457_vm4, %vm473_vm6  ;;  %vm477_vm4 = vcmp.lt.s32.totalorder %v425_v11, %v1241_v43 }
  0x5b   :  { %1077 = vmatprep.subr.bf16.mxu0 %v1154_v46  ;;  %1058 = vmatpush3.bf16.msk.msra.mxu1 %vm1057_vm2, %v1155_v53  ;;  %vm1060_vm10 = vmpackc.low %vm490_vm9, %vm489_vm8  ;;  %vm463_vm9 = vcmp.ge.s32.totalorder %v427_v14, %v1239_v42 }
  0x5c   :  { %1059 = vmatprep.subr.bf16.mxu1 %v1154_v46 }
  0x5e   :  { %1079 = vmatpush3.bf16.msk.msra.mxu0 %vm1054_vm15, %v1155_v53  ;;  %vm491_vm15 = vmand %vm459_vm11, %vm475_vm13  ;;  %vm479_vm11 = vcmp.lt.s32.totalorder %v427_v14, %v1241_v43 }
  0x5f   :  { %1080 = vmatprep.subr.bf16.mxu0 %v1154_v46  ;;  %1061 = vmatpush3.bf16.msk.msra.mxu1 %vm1060_vm10, %v1155_v53  ;;  %vm1063_vm1 = vmpackc.low %vm492_vm0, %vm491_vm15  ;;  %vm1157_vm0 = vmmov 0  }
  0x60   :  { %1062 = vmatprep.subr.bf16.mxu1 %v1154_v46  ;;  %vm495_vm13 = vmand %vm463_vm9, %vm479_vm11  ;;  %913 = vmatprep.mubr.msk.f32.mxu1 %vm1157_vm0, %v1158_v16 }
  0x61   :  { %948 = vmatprep.mubr.msk.f32.mxu0 %vm1157_vm0, %v1158_v16 }
  0x62   :  { %1082 = vmatpush3.bf16.msk.msra.mxu0 %vm1057_vm2, %v1155_v53  ;;  %vm461_vm2 = vcmp.ge.s32.totalorder %v425_v11, %v1239_v42 }
  0x63   :  { %1083 = vmatprep.subr.bf16.mxu0 %v1154_v46  ;;  %1064 = vmatpush3.bf16.msk.msra.mxu1 %vm1063_vm1, %v1155_v53  ;;  %vm1339_vm6 = vmand %vm461_vm2, %vm477_vm4 }
  0x64   :  { %1065 = vmatprep.subr.bf16.mxu1 %v1154_v46 }
  0x66   :  { %1085 = vmatpush3.bf16.msk.msra.mxu0 %vm1060_vm10, %v1155_v53  ;;  %vm464_vm10 = vcmp.ge.s32.totalorder %v428_v15, %v1239_v42 }
  0x67   :  { %1086 = vmatprep.subr.bf16.mxu0 %v1154_v46  ;;  %vm496_vm14 = vmand %vm464_vm10, %vm480_vm12 }
  0x68   :  { %vm1069_vm15 = vmpackc.low %vm496_vm14, %vm495_vm13 }
  0x6a   :  { %1088 = vmatpush3.bf16.msk.msra.mxu0 %vm1063_vm1, %v1155_v53 }
  0x6b   :  { %1089 = vmatprep.subr.bf16.mxu0 %v1154_v46 }
  0xb4   :  { %v365_v17 = vpop.permute.xlu1 %364 }
  0xb5   :  { %vm366_vm1 = vcmp.eq.s32.totalorder %v1219_v23, %v365_v17 }
  0xb6   :  { %v688_v27 = vsel %vm366_vm1, 1.0, %v1158_v16 }
  0xb9   :  { %v372_v18 = vpop.permute.xlu1 %371 }
  0xba   :  { %vm373_vm2 = vcmp.eq.s32.totalorder %v1219_v23, %v372_v18 }
  0xbb   :  { %v689_v30 = vsel %vm373_vm2, 1.0, %v1158_v16 }
  0xbe   :  { %v379_v19 = vpop.permute.xlu1 %378 }
  0xc3   :  { %v386_v21 = vpop.permute.xlu1 %385 }
  0xc8   :  { %v393_v25 = vpop.permute.xlu1 %392 }
  0xcd   :  { %v400_v32 = vpop.permute.xlu1 %399 }
 0x108   :  { %v774_v57 = vpop.f32.mrb[0].mxu0 }
 0x109   :  { %v775_v59 = vpop.f32.mrb[1].mxu0 }
 0x10a   :  { %v809_v60 = vpop.f32.mrb[0].mxu1  ;;  %v776_v61 = vadd.f32 %v775_v59, %v774_v57 }
 0x10b   :  { %v810_v62 = vpop.f32.mrb[1].mxu1 }
 0x10c   :  { %v811_v63 = vadd.f32 %v810_v62, %v809_v60  ;;  %v209_v0 = vadd.f32 %v776_v61, %v686_v58 }
 0x10e   :  { %v279_v1 = vadd.f32 %v811_v63, %v209_v0 }
 0x128   :  { %v844_v2 = vpop.f32.mrb[2].mxu0 }
 0x129   :  { %v845_v3 = vpop.f32.mrb[3].mxu0 }
 0x12a   :  { %v846_v4 = vadd.f32 %v845_v3, %v844_v2 }
 0x12c   :  { %v1305_v5 = vadd.f32 %v846_v4, %v279_v1 }
 0x12e   :  { %352 = vst [vmem:[%s1377_s4] sm:$0xff] %v1305_v5  ;;  %v1312_v6 = vsel %vm405_vm3, %v1305_v5, -1e+30  ;;  %vm462_vm3 = vcmp.ge.s32.totalorder %v426_v12, %v1239_v42 }
 0x12f   :  { %407 = vmax.xlane.f32.xlu0 %v1312_v6  ;;  %vm494_vm7 = vmand %vm462_vm3, %vm478_vm5  ;;  %vm380_vm3 = vcmp.eq.s32.totalorder %v1219_v23, %v379_v19  ;;  %vm387_vm5 = vcmp.eq.s32.totalorder %v1219_v23, %v386_v21 }
 0x130   :  { %vm1066_vm8 = vmpackc.low %vm494_vm7, %vm1339_vm6  ;;  %v690_v31 = vsel %vm380_vm3, 1.0, %v1158_v16  ;;  %vm394_vm6 = vcmp.eq.s32.totalorder %v1219_v23, %v393_v25  ;;  %v691_v34 = vsel %vm387_vm5, 1.0, %v1158_v16  ;;  %vm401_vm7 = vcmp.eq.s32.totalorder %v1219_v23, %v400_v32 }
 0x131   :  { %1067 = vmatpush3.bf16.msk.msra.mxu1 %vm1066_vm8, %v1155_v53  ;;  %1091 = vmatpush3.bf16.msk.msra.mxu0 %vm1066_vm8, %v1155_v53  ;;  %v692_v37 = vsel %vm394_vm6, 1.0, %v1158_v16  ;;  %v693_v39 = vsel %vm401_vm7, 1.0, %v1158_v16  ;;  %vm675_vm8 = vcmask 64512  }
 0x132   :  { %1068 = vmatprep.subr.bf16.mxu1 %v1154_v46  ;;  %1092 = vmatprep.subr.bf16.mxu0 %v1154_v46 }
 0x135   :  { %1070 = vmatpush3.bf16.msk.msra.mxu1 %vm1069_vm15, %v1155_v53  ;;  %1094 = vmatpush3.bf16.msk.msra.mxu0 %vm1069_vm15, %v1155_v53 }
 0x145   :  { %357 = vperm.xlu0 %1109, %v1224_v24  }
 0x149   :  { %1116 = vset.pattern.permute.xlu0 %v1156_v56 }
 0x1bc   :  { %v408_v20 = vpop.xlane.xlu0 %407 }
 0x1bd   :  { %v409_v22 = vsub.f32 %v1312_v6, %v408_v20 }
 0x1bf   :  { %v410_v24 = vmul.f32 1.442695, %v409_v22 }
 0x1c1   :  { %1117 = vpow2.f32 %v410_v24 }
 0x1c4   :  { %v358_v26 = vpop.permute.xlu0 %357 }
 0x1c5   :  { %vm359_vm4 = vcmp.eq.s32.totalorder %v1219_v23, %v358_v26 }
 0x1c6   :  { %v687_v28 = vsel %vm359_vm4, 1.0, %v1158_v16 }
 0x1c7   :  { %v369_v29 = vadd.f32 %v688_v27, %v687_v28 }
 0x1c9   :  { %v376_v33 = vadd.f32 %v689_v30, %v369_v29 }
 0x1cb   :  { %v1118_v35 = vpop.eup %1117  ;;  %v383_v36 = vadd.f32 %v690_v31, %v376_v33 }
 0x1cc   :  { %914 = vmatmul.mubr.f32.vlgmr.msra.gmra.mrb[2].mxu1 %v1118_v35 }
 0x1cd   :  { %v390_v38 = vadd.f32 %v691_v34, %v383_v36 }
 0x1cf   :  { %v397_v40 = vadd.f32 %v692_v37, %v390_v38 }
 0x1d1   :  { %v404_v41 = vadd.f32 %v693_v39, %v397_v40 }
 0x1d3   :  { %v599_v42 = vmul.f32 %v404_v41, %v1305_v5 }
 0x1d5   :  { %949 = vmatmul.mubr.f32.vlgmr.msra.gmra.mrb[4].mxu0 %v599_v42 }
 0x29f   :  { %v595_v43 = vpop.f32.mrb[2].mxu1 }
 0x2a0   :  { %v670_v44 = vmax.f32 %v595_v43, 1e-30  ;;  %v915_v45 = vpop.f32.mrb[3].mxu1 }
 0x2a2   :  { %1119 = vlog2.f32 %v670_v44 }
 0x2a8   :  { %v666_v46 = vpop.f32.mrb[4].mxu0 }
 0x2a9   :  { %v950_v47 = vpop.f32.mrb[5].mxu0 }
 0x2ac   :  { %v1120_v48 = vpop.eup %1119 }
 0x2ad   :  { %v672_v49 = vmul.f32 0.6931472, %v1120_v48 }
 0x2af   :  { %v673_v50 = vadd.f32 %v672_v49, %v408_v20 }
 0x2b1   :  { %v674_v23 = vsub.f32 %v673_v50, %v666_v46 }
 0x2b3   :  { %676 = vst.msk [vmem:[%s1378_s5] sm:$0xff] %vm675_vm8, %v674_v23 }
 0x2b4   :  { %685 = vsyncpa [#allocation3], 1 }

</bundles_post_ra>
